<compile_context>
chip_gen: v6e
topology: v6e:2x2x1
jax: 0.10.0
libtpu: 0.0.40
codegen_flags: <defaults>
</compile_context>

<pallas_src>
import numpy as np
import jax
import jax.numpy as jnp
from jax.experimental import pallas as pl
from jax.experimental.pallas import tpu as pltpu


def _interp_matrix(l_in, l_out):
    """Matrix M (l_in, l_out) s.t. y = x @ M == F.interpolate(x, l_out,
    mode='linear', align_corners=False) along the last axis."""
    j = np.arange(l_out)
    scale = l_in / l_out
    src = scale * (j + 0.5) - 0.5
    src = np.maximum(src, 0.0)
    idx0 = np.minimum(np.floor(src).astype(np.int64), l_in - 1)
    idx1 = np.minimum(idx0 + 1, l_in - 1)
    lam1 = np.clip(src - idx0, 0.0, 1.0)
    lam0 = 1.0 - lam1
    m = np.zeros((l_in, l_out), dtype=np.float32)
    np.add.at(m, (idx0, j), lam0)
    np.add.at(m, (idx1, j), lam1)
    return m


def _pfconnect_kernel(x_ref, mcat_ref, wblk_ref, bblk_ref, wgt_ref, bgt_ref,
                      out_ref):
    E = wgt_ref.shape[0]
    # 1) fused linear resize of all (batch-folded) pyramid levels to length L1
    r = jnp.dot(mcat_ref[...], x_ref[...],
                preferred_element_type=jnp.float32)          # (B*L1, Cpad)
    # 2) fused block-diagonal channel projections + all biases (added once,
    #    after the resize — exact since interp columns sum to 1)
    p = jnp.dot(r, wblk_ref[...],
                preferred_element_type=jnp.float32) + bblk_ref[...]   # (B*L1, 4E)
    # 3) global_weight = Conv1d(E, E, 1)(_f4); weight pre-tiled so the result
    #    is already (B*L1, 4E) with zeros on the _f4 block
    gw = jnp.dot(p[:, :E], wgt_ref[...],
                 preferred_element_type=jnp.float32) + bgt_ref[...]   # (B*L1, 4E)
    # 4) concat([_f4, gw+_f3, gw+_f2, gw+_f1]) == P + GW; one lane-dense store
    out_ref[...] = p + gw


def pfconnect_forward(feats, params):
    f1, f2, f3, f4 = feats
    (w1, b1), (w2, b2), (w3, b3), (w4, b4), (wg, bg) = params
    B, C1, L1 = f1.shape
    _, C2, L2 = f2.shape
    _, C3, L3 = f3.shape
    _, C4, L4 = f4.shape
    E = wg.shape[0]

    # ---- shape-only constants: batch-folded resize matrices, row-concat ----
    eye_b = np.eye(B, dtype=np.float32)
    mcat = np.concatenate([
        np.kron(eye_b, _interp_matrix(L4, L1).T),   # (B*L1, B*L4)
        np.kron(eye_b, _interp_matrix(L3, L1).T),   # (B*L1, B*L3)
        np.kron(eye_b, _interp_matrix(L2, L1).T),   # (B*L1, B*L2)
        np.kron(eye_b, _interp_matrix(L1, L1).T),   # identity (B*L1, B*L1)
    ], axis=1).astype(np.float32)                   # (B*L1, B*(L4+L3+L2+L1))
    mcat = jnp.asarray(mcat)

    ctot = C4 + C3 + C2 + C1
    cpad = max(128, -(-ctot // 128) * 128)          # lane-pad the channel axis
    offs = (0, C4, C4 + C3, C4 + C3 + C2)

    # ---- parameter packing: block-diagonal projection weight & fused biases ----
    wblk = jnp.zeros((cpad, 4 * E), jnp.float32)
    for k, (w, off) in enumerate(zip((w4, w3, w2, w1), offs)):
        wblk = wblk.at[off:off + w.shape[1], k * E:(k + 1) * E].set(w.T)
    bblk = jnp.concatenate([b4.T, b3.T, b2.T, b1.T], axis=1)          # (1, 4E)

    zE = jnp.zeros((E, E), jnp.float32)
    wgt = jnp.concatenate([zE, wg.T, wg.T, wg.T], axis=1)             # (E, 4E)
    bgt = jnp.concatenate([jnp.zeros((1, E), jnp.float32), bg.T, bg.T, bg.T],
                          axis=1)                                     # (1, 4E)

    # ---- per-call input packing: fold batch into rows, channels along lanes ----
    def fold(f):                       # (B, C, L) -> (B*L, C)
        return jnp.transpose(f, (0, 2, 1)).reshape(-1, f.shape[1])

    def place(x, off):                 # zero-pad channels into the packed layout
        return jnp.pad(x, ((0, 0), (off, cpad - off - x.shape[1])))

    xpack = jnp.concatenate([place(fold(f4), offs[0]),
                             place(fold(f3), offs[1]),
                             place(fold(f2), offs[2]),
                             place(fold(f1), offs[3])],
                            axis=0)                                   # (ΣB*Li, cpad)

    bl1 = B * L1

    def full_spec(a):
        return pl.BlockSpec(a.shape, lambda i: (0, 0))

    out2d = pl.pallas_call(
        _pfconnect_kernel,
        out_shape=jax.ShapeDtypeStruct((bl1, 4 * E), jnp.float32),
        grid=(1,),
        in_specs=[full_spec(xpack), full_spec(mcat), full_spec(wblk),
                  full_spec(bblk), full_spec(wgt), full_spec(bgt)],
        out_specs=pl.BlockSpec((bl1, 4 * E), lambda i: (0, 0)),
        compiler_params=pltpu.CompilerParams(
            dimension_semantics=("arbitrary",)),
    )(xpack, mcat, wblk, bblk, wgt, bgt)

    # lane-dense (B*L1, 4E) -> PyTorch NCL (B, 4E, L1)
    return jnp.transpose(out2d.reshape(B, L1, 4 * E), (0, 2, 1))


def pfconnect_reference(feats, params):
    """Pure-JAX reference mirroring the PyTorch forward."""
    f1, f2, f3, f4 = feats
    (w1, b1), (w2, b2), (w3, b3), (w4, b4), (wg, bg) = params
    L1 = f1.shape[2]

    def branch(f, w, b):
        p = jnp.einsum('ec,bcl->bel', w, f) + b[None, :, :]       # (B, E, Li)
        m = jnp.asarray(_interp_matrix(f.shape[2], L1))
        return jnp.einsum('bel,lj->bej', p, m)                    # (B, E, L1)

    _f4 = branch(f4, w4, b4)
    _f3 = branch(f3, w3, b3)
    _f2 = branch(f2, w2, b2)
    _f1 = branch(f1, w1, b1)
    gw = jnp.einsum('oe,bel->bol', wg, _f4) + bg[None, :, :]
    return jnp.concatenate([_f4, gw + _f3, gw + _f2, gw + _f1], axis=1)


if __name__ == "__main__":
    B = 2
    E = 32                           # embedding_dim  -> 4E = 128 output lanes
    C1, C2, C3, C4 = 8, 16, 32, 64   # inter_channels
    L1, L2, L3, L4 = 16, 8, 8, 4     # per-level sequence lengths

    key = jax.random.PRNGKey(0)
    ks = jax.random.split(key, 14)

    f1 = jax.random.normal(ks[0], (B, C1, L1), jnp.float32)
    f2 = jax.random.normal(ks[1], (B, C2, L2), jnp.float32)
    f3 = jax.random.normal(ks[2], (B, C3, L3), jnp.float32)
    f4 = jax.random.normal(ks[3], (B, C4, L4), jnp.float32)

    # deterministic synthetic parameters (shapes follow the nn.Module __init__)
    w1 = jax.random.normal(ks[4], (E, C1), jnp.float32) * 0.1
    b1 = jax.random.normal(ks[5], (E, 1), jnp.float32) * 0.1
    w2 = jax.random.normal(ks[6], (E, C2), jnp.float32) * 0.1
    b2 = jax.random.normal(ks[7], (E, 1), jnp.float32) * 0.1
    w3 = jax.random.normal(ks[8], (E, C3), jnp.float32) * 0.1
    b3 = jax.random.normal(ks[9], (E, 1), jnp.float32) * 0.1
    w4 = jax.random.normal(ks[10], (E, C4), jnp.float32) * 0.1
    b4 = jax.random.normal(ks[11], (E, 1), jnp.float32) * 0.1
    wg = jax.random.normal(ks[12], (E, E), jnp.float32) * 0.1     # Conv1d k=1 weight
    bg = jax.random.normal(ks[13], (E, 1), jnp.float32) * 0.1

    feats = (f1, f2, f3, f4)
    params = ((w1, b1), (w2, b2), (w3, b3), (w4, b4), (wg, bg))

    out = pfconnect_forward(feats, params)
    out = jax.block_until_ready(out)
    assert out.shape == (B, 4 * E, L1), out.shape

    ref = pfconnect_reference(feats, params)
    np.testing.assert_allclose(np.asarray(out), np.asarray(ref),
                               rtol=2e-5, atol=2e-5)
    print("KERNEL_OK")
</pallas_src>

<mosaic_0001>
module attributes {stable_mosaic.version = 11 : i64} {
  func.func @_pfconnect_kernel(%arg0: i32, %arg1: memref<72x128xf32, #tpu.memory_space<vmem>>, %arg2: memref<32x72xf32, #tpu.memory_space<vmem>>, %arg3: memref<128x128xf32, #tpu.memory_space<vmem>>, %arg4: memref<1x128xf32, #tpu.memory_space<vmem>>, %arg5: memref<32x128xf32, #tpu.memory_space<vmem>>, %arg6: memref<1x128xf32, #tpu.memory_space<vmem>>, %arg7: memref<32x128xf32, #tpu.memory_space<vmem>>) attributes {dimension_semantics = [#tpu.dimension_semantics<arbitrary>], iteration_bounds = array<i64: 1>, scalar_prefetch = 0 : i64, scratch_operands = 0 : i64, tpu.core_type = #tpu.core_type<tc>, window_params = [{pipeline_mode = #tpu.pipeline_mode<synchronous>, transform_indices = @transform_0, window_bounds = array<i64: 72, 128>}, {pipeline_mode = #tpu.pipeline_mode<synchronous>, transform_indices = @transform_1, window_bounds = array<i64: 32, 72>}, {pipeline_mode = #tpu.pipeline_mode<synchronous>, transform_indices = @transform_2, window_bounds = array<i64: 128, 128>}, {pipeline_mode = #tpu.pipeline_mode<synchronous>, transform_indices = @transform_3, window_bounds = array<i64: 1, 128>}, {pipeline_mode = #tpu.pipeline_mode<synchronous>, transform_indices = @transform_4, window_bounds = array<i64: 32, 128>}, {pipeline_mode = #tpu.pipeline_mode<synchronous>, transform_indices = @transform_5, window_bounds = array<i64: 1, 128>}, {pipeline_mode = #tpu.pipeline_mode<synchronous>, transform_indices = @transform_6, window_bounds = array<i64: 32, 128>}]} {
    %c0 = arith.constant 0 : index
    %c0_0 = arith.constant 0 : index
    %0 = vector.load %arg2[%c0, %c0_0] : memref<32x72xf32, #tpu.memory_space<vmem>>, vector<32x72xf32>
    %c0_1 = arith.constant 0 : index
    %c0_2 = arith.constant 0 : index
    %1 = vector.load %arg1[%c0_1, %c0_2] : memref<72x128xf32, #tpu.memory_space<vmem>>, vector<72x128xf32>
    %cst = arith.constant dense<0.000000e+00> : vector<32x128xf32>
    %2 = tpu.matmul %0, %1, %cst {dimension_numbers = #tpu.dot_dimension_numbers<[1], [0], [0], [1], [0, 0, 1, 1], [], []>} : vector<32x72xf32>, vector<72x128xf32>, vector<32x128xf32> -> vector<32x128xf32>
    %c0_3 = arith.constant 0 : index
    %c0_4 = arith.constant 0 : index
    %3 = vector.load %arg3[%c0_3, %c0_4] : memref<128x128xf32, #tpu.memory_space<vmem>>, vector<128x128xf32>
    %cst_5 = arith.constant dense<0.000000e+00> : vector<32x128xf32>
    %4 = tpu.matmul %2, %3, %cst_5 {dimension_numbers = #tpu.dot_dimension_numbers<[1], [0], [0], [1], [0, 0, 1, 1], [], []>} : vector<32x128xf32>, vector<128x128xf32>, vector<32x128xf32> -> vector<32x128xf32>
    %c0_6 = arith.constant 0 : index
    %c0_7 = arith.constant 0 : index
    %5 = vector.load %arg4[%c0_6, %c0_7] : memref<1x128xf32, #tpu.memory_space<vmem>>, vector<1x128xf32>
    %6 = vector.broadcast %5 : vector<1x128xf32> to vector<32x128xf32>
    %7 = arith.addf %4, %6 : vector<32x128xf32>
    %8 = vector.extract_strided_slice %7 {offsets = [0, 0], sizes = [32, 32], strides = [1, 1]} : vector<32x128xf32> to vector<32x32xf32>
    %c0_8 = arith.constant 0 : index
    %c0_9 = arith.constant 0 : index
    %9 = vector.load %arg5[%c0_8, %c0_9] : memref<32x128xf32, #tpu.memory_space<vmem>>, vector<32x128xf32>
    %cst_10 = arith.constant dense<0.000000e+00> : vector<32x128xf32>
    %10 = tpu.matmul %8, %9, %cst_10 {dimension_numbers = #tpu.dot_dimension_numbers<[1], [0], [0], [1], [0, 0, 1, 1], [], []>} : vector<32x32xf32>, vector<32x128xf32>, vector<32x128xf32> -> vector<32x128xf32>
    %c0_11 = arith.constant 0 : index
    %c0_12 = arith.constant 0 : index
    %11 = vector.load %arg6[%c0_11, %c0_12] : memref<1x128xf32, #tpu.memory_space<vmem>>, vector<1x128xf32>
    %12 = vector.broadcast %11 : vector<1x128xf32> to vector<32x128xf32>
    %13 = arith.addf %10, %12 : vector<32x128xf32>
    %14 = arith.addf %7, %13 : vector<32x128xf32>
    %c0_13 = arith.constant 0 : index
    %c0_14 = arith.constant 0 : index
    %15 = vector.load %arg7[%c0_13, %c0_14] : memref<32x128xf32, #tpu.memory_space<vmem>>, vector<32x128xf32>
    tpu.vector_store %arg7[%c0_13, %c0_14], %14 {strides = array<i32>} : memref<32x128xf32, #tpu.memory_space<vmem>>, vector<32x128xf32>,
    return
  }
  func.func @transform_0(%arg0: i32) -> (i32, i32) {
    %c0_i32 = arith.constant 0 : i32
    %c0_i32_0 = arith.constant 0 : i32
    %c0_i32_1 = arith.constant 0 : i32
    return %c0_i32, %c0_i32_0 : i32, i32
  }
  func.func @transform_1(%arg0: i32) -> (i32, i32) {
    %c0_i32 = arith.constant 0 : i32
    %c0_i32_0 = arith.constant 0 : i32
    %c0_i32_1 = arith.constant 0 : i32
    return %c0_i32, %c0_i32_0 : i32, i32
  }
  func.func @transform_2(%arg0: i32) -> (i32, i32) {
    %c0_i32 = arith.constant 0 : i32
    %c0_i32_0 = arith.constant 0 : i32
    %c0_i32_1 = arith.constant 0 : i32
    return %c0_i32, %c0_i32_0 : i32, i32
  }
  func.func @transform_3(%arg0: i32) -> (i32, i32) {
    %c0_i32 = arith.constant 0 : i32
    %c0_i32_0 = arith.constant 0 : i32
    %c0_i32_1 = arith.constant 0 : i32
    return %c0_i32, %c0_i32_0 : i32, i32
  }
  func.func @transform_4(%arg0: i32) -> (i32, i32) {
    %c0_i32 = arith.constant 0 : i32
    %c0_i32_0 = arith.constant 0 : i32
    %c0_i32_1 = arith.constant 0 : i32
    return %c0_i32, %c0_i32_0 : i32, i32
  }
  func.func @transform_5(%arg0: i32) -> (i32, i32) {
    %c0_i32 = arith.constant 0 : i32
    %c0_i32_0 = arith.constant 0 : i32
    %c0_i32_1 = arith.constant 0 : i32
    return %c0_i32, %c0_i32_0 : i32, i32
  }
  func.func @transform_6(%arg0: i32) -> (i32, i32) {
    %c0_i32 = arith.constant 0 : i32
    %c0_i32_0 = arith.constant 0 : i32
    %c0_i32_1 = arith.constant 0 : i32
    return %c0_i32, %c0_i32_0 : i32, i32
  }
}

</mosaic_0001>

<bundles_post_ra>
// kernel: tpu_custom_call.1
= control target key start
LH: loop header
LB: loop body
LE: loop exit
PB: predicated region body
PF: predicated region fallthrough
CT: control target
= control target key end

     0   :  { %11 = vsyncpa [#allocation3], 0  ;;  %s758_s0 = inlined_call_operand.hbm [shape: f32[72,128], index: 0, kind: input, shape index: {}]   ;;  %s759_s1 = inlined_call_operand.hbm [shape: f32[32,72], index: 1, kind: input, shape index: {}]   ;;  %s760_s2 = inlined_call_operand.hbm [shape: f32[128,128], index: 2, kind: input, shape index: {}]   ;;  %s761_s3 = inlined_call_operand.vmem [shape: f32[1,128], index: 3, kind: input, shape index: {}]   ;;  %s762_s4 = inlined_call_operand.hbm [shape: f32[32,128], index: 4, kind: input, shape index: {}]   ;;  %s763_s5 = inlined_call_operand.vmem [shape: f32[1,128], index: 5, kind: input, shape index: {}]   ;;  %s764_s6 = inlined_call_operand.hbm [shape: f32[32,128], index: 6, kind: output, shape index: {}]  }
   0x1   :  { %12 = vsyncpa [#allocation6], 0 }
   0x2   :  { %13 = vsyncpa [#allocation9], 0 }
   0x3   :  { %14 = vsyncpa [#allocation4], 0  ;;  %s676_s21 = smov [#allocation5]   ;;  %s677_s23 = smov [#allocation2]  }
   0x4   :  { %s32_s22 = sshll.u32 %s676_s21, 4  ;;  %s20_s24 = sshll.u32 %s677_s23, 4  ;;  %s33_s22 = int_to_ptr.vmem [resolvable:$true] %s32_s22  ;;  %s21_s24 = int_to_ptr.vmem [resolvable:$true] %s20_s24 }
   0x5   :  { %s576_s25 = scalar_lea.vmem %s33_s22, 512  ;;  %p581_p1 = scmp.lt.s32.totalorder %s33_s22, %s33_s22 }
   0x6   :  { %p577_p0 = scmp.ne.s32.totalorder %s33_s22, %s576_s25  ;;  %p582_p2 = scmp.lt.s32.totalorder %s576_s25, %s576_s25 }
   0x8   :  { %p583_p3 = por %p582_p2, %p581_p1 }
   0xa   :  { %p584_p4 = pnand %p583_p3, %p577_p0 }
   0xc   :  { %587 = shalt.err (!%p584_p4)
}
   0xd   :  { %s678_s26 = smov 128   ;;  %s679_s27 = smov 8  }
   0xe   :  { %38 = dma.hbm_to_vmem [thread:$0]  %s759_s1, 512, %s33_s22, [#allocation6], %s678_s26, %s678_s26, %s679_s27  }
   0xf   :  { %s596_s30 = scalar_lea.vmem %s21_s24, 1152  ;;  %p601_p6 = scmp.lt.s32.totalorder %s21_s24, %s21_s24 }
  0x10   :  { %p597_p5 = scmp.ne.s32.totalorder %s21_s24, %s596_s30  ;;  %p602_p7 = scmp.lt.s32.totalorder %s596_s30, %s596_s30 }
  0x12   :  { %p603_p8 = por %p602_p7, %p601_p6 }
  0x14   :  { %p604_p9 = pnand %p603_p8, %p597_p5 }
  0x16   :  { %607 = shalt.err (!%p604_p9)
}
  0x17   :  { %26 = dma.hbm_to_vmem [thread:$0]  %s758_s0, 1152, %s21_s24, [#allocation3], %s678_s26, %s678_s26, %s679_s27  }
  0x18   :  { %s680_s9 = smov [#allocation7]   ;;  %s681_s11 = smov [#allocation8]  }
  0x19   :  { %s44_s10 = sshll.u32 %s680_s9, 4  ;;  %s58_s12 = sshll.u32 %s681_s11, 4  ;;  %s45_s10 = int_to_ptr.vmem [resolvable:$true] %s44_s10  ;;  %s59_s12 = int_to_ptr.vmem [resolvable:$true] %s58_s12 }
  0x1a   :  { %s616_s1 = scalar_lea.vmem %s45_s10, 2048  ;;  %p621_p11 = scmp.lt.s32.totalorder %s45_s10, %s45_s10 }
  0x1b   :  { %p617_p10 = scmp.ne.s32.totalorder %s45_s10, %s616_s1  ;;  %p622_p12 = scmp.lt.s32.totalorder %s616_s1, %s616_s1 }
  0x1d   :  { %p623_p13 = por %p622_p12, %p621_p11 }
  0x1f   :  { %p624_p0 = pnand %p623_p13, %p617_p10 }
  0x21   :  { %627 = shalt.err (!%p624_p0)
}
  0x22   :  { %50 = dma.hbm_to_vmem [thread:$0]  %s760_s2, 2048, %s45_s10, [#allocation6], %s678_s26, %s678_s26, %s679_s27  }
  0x23   :  { %s636_s0 = scalar_lea.vmem %s59_s12, 512  ;;  %p641_p2 = scmp.lt.s32.totalorder %s59_s12, %s59_s12 }
  0x24   :  { %p637_p1 = scmp.ne.s32.totalorder %s59_s12, %s636_s0  ;;  %p642_p3 = scmp.lt.s32.totalorder %s636_s0, %s636_s0 }
  0x26   :  { %p643_p4 = por %p642_p3, %p641_p2 }
  0x28   :  { %p644_p5 = pnand %p643_p4, %p637_p1 }
  0x2a   :  { %647 = shalt.err (!%p644_p5)
}
  0x2b   :  { %64 = dma.hbm_to_vmem [thread:$0]  %s762_s4, 512, %s59_s12, [#allocation9], %s678_s26, %s678_s26, %s679_s27  }
  0x2c   :  { %668 = dma.done.wait [#allocation3], 1152  }
  0x2d   :  { %669 = vsyncadd [#allocation3], 4294966144 }
  0x2e   :  { %670 = dma.done.wait [#allocation6], 2560  }
  0x2f   :  { %671 = vsyncadd [#allocation6], 4294964736 }
  0x30   :  { %672 = dma.done.wait [#allocation9], 512  }
  0x31   :  { %673 = vsyncadd [#allocation9], 4294966784  ;;  %v91_v0 = vld [vmem:[#allocation2 + $0x40] sm:$0xff]  ;;  %v90_v1 = vld [vmem:[#allocation2 + $0x38] sm:$0xff]  ;;  %vm92_vm0 = vcmask 588800   ;;  %vm309_vm1 = vcmask 261120  }
  0x32   :  { %485 = vmatprep.subr.mxu0 %v91_v0  ;;  %v89_v2 = vld [vmem:[#allocation2 + $0x30] sm:$0xff]  ;;  %v79_v3 = vld [vmem:[#allocation5] sm:$0xff]  ;;  %v205_v5 = vld [vmem:[#allocation7 + $0x78] sm:$0xff] }
  0x33   :  { %486 = vmatpush3.msra.mxu0 %v91_v0  ;;  %v88_v4 = vld [vmem:[#allocation2 + $0x28] sm:$0xff]  ;;  %503 = vmatprep.mubr.msk.f32.mxu0 %vm92_vm0, %v79_v3  ;;  %v204_v6 = vld [vmem:[#allocation7 + $0x70] sm:$0xff]  ;;  %v87_v7 = vld [vmem:[#allocation2 + $0x20] sm:$0xff] }
  0x34   :  { %487 = vmatprep.subr.mxu0 %v90_v1  ;;  %509 = vmatprep.subr.mxu1 %v205_v5  ;;  %v203_v8 = vld [vmem:[#allocation7 + $0x68] sm:$0xff]  ;;  %v86_v9 = vld [vmem:[#allocation2 + $0x18] sm:$0xff]  ;;  %v202_v10 = vld [vmem:[#allocation7 + $0x60] sm:$0xff] }
  0x35   :  { %488 = vmatpush3.msra.mxu0 %v90_v1  ;;  %510 = vmatpush3.msra.mxu1 %v205_v5  ;;  %v85_v11 = vld [vmem:[#allocation2 + $0x10] sm:$0xff]  ;;  %v201_v12 = vld [vmem:[#allocation7 + $0x58] sm:$0xff]  ;;  %v84_v13 = vld [vmem:[#allocation2 + $0x8] sm:$0xff] }
  0x36   :  { %489 = vmatprep.subr.mxu0 %v89_v2  ;;  %511 = vmatprep.subr.mxu1 %v204_v6  ;;  %v200_v14 = vld [vmem:[#allocation7 + $0x50] sm:$0xff]  ;;  %v83_v15 = vld [vmem:[#allocation2] sm:$0xff]  ;;  %v199_v16 = vld [vmem:[#allocation7 + $0x48] sm:$0xff] }
  0x37   :  { %490 = vmatpush3.msra.mxu0 %v89_v2  ;;  %512 = vmatpush3.msra.mxu1 %v204_v6  ;;  %v80_v17 = vld [vmem:[#allocation5 + $0x8] sm:$0xff]  ;;  %v198_v18 = vld [vmem:[#allocation7 + $0x40] sm:$0xff]  ;;  %v81_v19 = vld [vmem:[#allocation5 + $0x10] sm:$0xff] }
  0x38   :  { %491 = vmatprep.subr.mxu0 %v88_v4  ;;  %513 = vmatprep.subr.mxu1 %v203_v8  ;;  %v197_v20 = vld [vmem:[#allocation7 + $0x38] sm:$0xff]  ;;  %v196_v22 = vld [vmem:[#allocation7 + $0x30] sm:$0xff]  ;;  %v195_v23 = vld [vmem:[#allocation7 + $0x28] sm:$0xff] }
  0x39   :  { %492 = vmatpush3.msra.mxu0 %v88_v4  ;;  %514 = vmatpush3.msra.mxu1 %v203_v8  ;;  %v82_v21 = vld [vmem:[#allocation5 + $0x18] sm:$0xff]  ;;  %v194_v24 = vld [vmem:[#allocation7 + $0x20] sm:$0xff]  ;;  %v192_v26 = vld [vmem:[#allocation7 + $0x10] sm:$0xff] }
  0x3a   :  { %493 = vmatprep.subr.mxu0 %v87_v7  ;;  %515 = vmatprep.subr.mxu1 %v202_v10  ;;  %v193_v25 = vld [vmem:[#allocation7 + $0x18] sm:$0xff]  ;;  %v191_v27 = vld [vmem:[#allocation7 + $0x8] sm:$0xff]  ;;  %v190_v28 = vld [vmem:[#allocation7] sm:$0xff] }
  0x3b   :  { %494 = vmatpush3.msra.mxu0 %v87_v7  ;;  %516 = vmatpush3.msra.mxu1 %v202_v10  ;;  %v301_v29 = vld [vmem:[#allocation8 + $0x18] sm:$0xff]  ;;  %v300_v30 = vld [vmem:[#allocation8 + $0x10] sm:$0xff]  ;;  %v299_v35 = vld [vmem:[#allocation8 + $0x8] sm:$0xff] }
  0x3c   :  { %495 = vmatprep.subr.mxu0 %v86_v9  ;;  %517 = vmatprep.subr.mxu1 %v201_v12  ;;  %v298_v36 = vld [vmem:[#allocation8] sm:$0xff]  ;;  %v438_v38 = vld [vmem:[%s761_s3] ss:$0 sm:$0xff]  ;;  %s682_s3 = smov [#allocation10]  }
  0x3d   :  { %496 = vmatpush3.msra.mxu0 %v86_v9  ;;  %518 = vmatpush3.msra.mxu1 %v201_v12  ;;  %v439_v46 = vld [vmem:[%s763_s5] ss:$0 sm:$0xff]  ;;  %s420_s19 = sshll.u32 %s682_s3, 4  ;;  %s421_s19 = int_to_ptr.vmem [resolvable:$true] %s420_s19 }
  0x3e   :  { %497 = vmatprep.subr.mxu0 %v85_v11  ;;  %519 = vmatprep.subr.mxu1 %v200_v14  ;;  %s648_s5 = scalar_lea.vmem %s421_s19, 512  ;;  %p653_p7 = scmp.lt.s32.totalorder %s421_s19, %s421_s19 }
  0x3f   :  { %498 = vmatpush3.msra.mxu0 %v85_v11  ;;  %520 = vmatpush3.msra.mxu1 %v200_v14  ;;  %p649_p6 = scmp.ne.s32.totalorder %s421_s19, %s648_s5  ;;  %p654_p8 = scmp.lt.s32.totalorder %s648_s5, %s648_s5 }
  0x40   :  { %499 = vmatprep.subr.mxu0 %v84_v13  ;;  %521 = vmatprep.subr.mxu1 %v199_v16 }
  0x41   :  { %500 = vmatpush3.msra.mxu0 %v84_v13  ;;  %522 = vmatpush3.msra.mxu1 %v199_v16  ;;  %p655_p9 = por %p654_p8, %p653_p7 }
  0x42   :  { %501 = vmatprep.subr.mxu0 %v83_v15  ;;  %523 = vmatprep.subr.mxu1 %v198_v18 }
  0x43   :  { %502 = vmatpush3.msra.mxu0 %v83_v15  ;;  %524 = vmatpush3.msra.mxu1 %v198_v18  ;;  %p656_p10 = pnand %p655_p9, %p649_p6 }
  0x44   :  { %504 = vmatmul.mubr.msk.f32.vlgmr.msra.gmra.mxu0 %vm92_vm0, %v80_v17  ;;  %525 = vmatprep.subr.mxu1 %v197_v20 }
  0x45   :  { %506 = vmatprep.mubr.msk.f32.mxu0 %vm92_vm0, %v81_v19  ;;  %526 = vmatpush3.msra.mxu1 %v197_v20 }
  0x46   :  { %527 = vmatprep.subr.mxu1 %v196_v22  ;;  %547 = vmatprep.subr.mxu0 %v301_v29 }
  0x47   :  { %528 = vmatpush3.msra.mxu1 %v196_v22  ;;  %548 = vmatpush3.msra.mxu0 %v301_v29 }
  0x48   :  { %507 = vmatmul.mubr.msk.f32.gmra.mxu0 %vm92_vm0, %v82_v21  ;;  %529 = vmatprep.subr.mxu1 %v195_v23 }
  0x49   :  { %530 = vmatpush3.msra.mxu1 %v195_v23  ;;  %549 = vmatprep.subr.mxu0 %v300_v30 }
  0x4a   :  { %531 = vmatprep.subr.mxu1 %v194_v24  ;;  %550 = vmatpush3.msra.mxu0 %v300_v30 }
  0x4b   :  { %532 = vmatpush3.msra.mxu1 %v194_v24  ;;  %551 = vmatprep.subr.mxu0 %v299_v35 }
  0x4c   :  { %533 = vmatprep.subr.mxu1 %v193_v25  ;;  %552 = vmatpush3.msra.mxu0 %v299_v35 }
  0x4d   :  { %534 = vmatpush3.msra.mxu1 %v193_v25  ;;  %553 = vmatprep.subr.mxu0 %v298_v36 }
  0x4e   :  { %535 = vmatprep.subr.mxu1 %v192_v26  ;;  %554 = vmatpush3.msra.mxu0 %v298_v36 }
  0x4f   :  { %536 = vmatpush3.msra.mxu1 %v192_v26 }
  0x50   :  { %537 = vmatprep.subr.mxu1 %v191_v27 }
  0x51   :  { %538 = vmatpush3.msra.mxu1 %v191_v27 }
  0x52   :  { %539 = vmatprep.subr.mxu1 %v190_v28 }
  0x53   :  { %540 = vmatpush3.msra.mxu1 %v190_v28 }
 0x104   :  { %v505_v31 = vpop.f32.mrf.mxu0 }
 0x106   :  { %v171_v32 = vpop.f32.mrf.mxu0 }
 0x107   :  { %541 = vmatprep.mubr.f32.mxu1 %v171_v32 }
 0x108   :  { %v508_v33 = vpop.f32.mrf.mxu0  ;;  %542 = vmatmul.mubr.f32.vlgmr.msra.gmra.mxu1 %v505_v31 }
 0x10a   :  { %v181_v34 = vpop.f32.mrf.mxu0 }
 0x10b   :  { %544 = vmatprep.mubr.f32.mxu1 %v181_v34 }
 0x10c   :  { %545 = vmatmul.mubr.f32.gmra.mxu1 %v508_v33 }
 0x1c8   :  { %v543_v37 = vpop.f32.mrf.mxu1 }
 0x1c9   :  { %v285_v41 = vadd.f32 %v543_v37, %v438_v38 }
 0x1ca   :  { %v279_v39 = vpop.f32.mrf.mxu1 }
 0x1cb   :  { %v280_v40 = vadd.f32 %v438_v38, %v279_v39 }
 0x1cc   :  { %v546_v42 = vpop.f32.mrf.mxu1 }
 0x1cd   :  { %555 = vmatprep.mubr.msk.f32.mxu0 %vm309_vm1, %v280_v40  ;;  %v295_v45 = vadd.f32 %v546_v42, %v438_v38 }
 0x1ce   :  { %v289_v43 = vpop.f32.mrf.mxu1  ;;  %556 = vmatmul.mubr.msk.f32.vlgmr.msra.gmra.mxu0 %vm309_vm1, %v285_v41 }
 0x1cf   :  { %v290_v44 = vadd.f32 %v438_v38, %v289_v43 }
 0x1d1   :  { %558 = vmatprep.mubr.msk.f32.mxu0 %vm309_vm1, %v290_v44 }
 0x1d2   :  { %559 = vmatmul.mubr.msk.f32.gmra.mxu0 %vm309_vm1, %v295_v45 }
 0x28e   :  { %v557_v47 = vpop.f32.mrf.mxu0 }
 0x28f   :  { %v394_v48 = vadd.f32 %v557_v47, %v439_v46 }
 0x290   :  { %v388_v49 = vpop.f32.mrf.mxu0 }
 0x291   :  { %v408_v50 = vadd.f32 %v394_v48, %v285_v41  ;;  %v389_v51 = vadd.f32 %v439_v46, %v388_v49 }
 0x292   :  { %v560_v52 = vpop.f32.mrf.mxu0 }
 0x293   :  { %412 = vst [vmem:[#allocation10 + $0x8] sm:$0xff] %v408_v50  ;;  %v407_v53 = vadd.f32 %v389_v51, %v280_v40  ;;  %v404_v54 = vadd.f32 %v560_v52, %v439_v46 }
 0x294   :  { %v398_v55 = vpop.f32.mrf.mxu0 }
 0x295   :  { %411 = vst [vmem:[#allocation10] sm:$0xff] %v407_v53  ;;  %v410_v56 = vadd.f32 %v404_v54, %v295_v45  ;;  %v399_v57 = vadd.f32 %v439_v46, %v398_v55 }
 0x297   :  { %414 = vst [vmem:[#allocation10 + $0x18] sm:$0xff] %v410_v56  ;;  %v409_v58 = vadd.f32 %v399_v57, %v290_v44 }
 0x299   :  { %413 = vst [vmem:[#allocation10 + $0x10] sm:$0xff] %v409_v58 }
 0x29a   :  { %659 = shalt.err (!%p656_p10)
}
 0x29b   :  { %426 = dma.vmem_to_hbm [thread:$0]  %s421_s19, 512, %s764_s6, [#allocation4], %s678_s26, %s678_s26, %s679_s27  }
 0x29c   :  { %674 = dma.done.wait [#allocation4], 512  }
 0x29d   :  { %675 = vsyncadd [#allocation4], 4294966784 }
 0x29e   :  { %430 = vsyncpa [#allocation3], 1 }
 0x29f   :  { %431 = vsyncpa [#allocation6], 1 }
 0x2a0   :  { %432 = vsyncpa [#allocation9], 1 }
 0x2a1   :  { %433 = vsyncpa [#allocation4], 1 }

</bundles_post_ra>
